<compile_context>
chip_gen: v5e
topology: v5e:2x2
jax: 0.10.0
libtpu: 0.0.40
codegen_flags: <defaults>
</compile_context>

<pallas_src>
import functools

import jax
import jax.numpy as jnp
from jax.experimental import pallas as pl
from jax.experimental.pallas import tpu as pltpu


def _round_up(n, m):
    return ((n + m - 1) // m) * m


def _pad2(a, rows, cols, dtype):
    a = a.astype(dtype)
    if a.shape != (rows, cols):
        a = jnp.pad(a, ((0, rows - a.shape[0]), (0, cols - a.shape[1])))
    return a


def _vmem_cap_bytes():
    try:
        return int(pltpu.get_tpu_info().vmem_capacity_bytes)
    except Exception:  # not on TPU / API unavailable -> conservative (v7x per-TC)
        return 64 * 2 ** 20


# ----------------------------- pass 1: forget gate -----------------------------
def _fg_kernel(hx_ref, x_ref, wfh_ref, wfx_ref, bf_ref, fg_ref, fghx_ref, *, tn):
    j = pl.program_id(0)
    # fg_in tile = hx @ W_f_hx[:, jT] + x @ W_f_x[:, jT] + b_f[jT]   (bf16 MXU, f32 acc)
    fg_in = (jnp.dot(hx_ref[...], wfh_ref[...], preferred_element_type=jnp.float32)
             + jnp.dot(x_ref[...], wfx_ref[...], preferred_element_type=jnp.float32)
             + bf_ref[...])
    fg = (jnp.clip(fg_in, -1.0, 1.0) + 1.0) * 0.5          # bipolar clip + scaled add
    off = pl.multiple_of(j * tn, 128)
    hx_t = hx_ref[:, pl.ds(off, tn)].astype(jnp.float32)    # matching hx column tile
    fg_ref[...] = fg
    fghx_ref[...] = (fg * hx_t).astype(fghx_ref.dtype)      # FSUMul with static hx


# --------------------------- pass 2: new gate + output -------------------------
def _ng_kernel(fghx_ref, x_ref, fg_ref, wnh_ref, wnx_ref, bn_ref, hy_ref, *, tn):
    j = pl.program_id(0)
    ng = (jnp.dot(fghx_ref[...], wnh_ref[...], preferred_element_type=jnp.float32)
          + jnp.dot(x_ref[...], wnx_ref[...], preferred_element_type=jnp.float32)
          + bn_ref[...])
    ng = jnp.clip(ng, -1.0, 1.0)                             # hardtanh / bipolar range
    off = pl.multiple_of(j * tn, 128)
    fghx_t = fghx_ref[:, pl.ds(off, tn)].astype(jnp.float32)
    fg = fg_ref[...]
    hy = ng - fg * ng + fghx_t                               # ng + (-fg*ng) + fg*hx
    hy_ref[...] = jnp.clip(hy, -1.0, 1.0).astype(hy_ref.dtype)


def prepare_mgu_params(weight_f, bias_f, weight_n, bias_n, input_size):
    """One-time weight prep (hoisted out of the per-step path): split the
    [H, H+I] weights into hx / x parts, transpose to [in, out], zero-pad to
    lane-dense multiples of 128 and cast to bf16 for the MXU."""
    H = int(weight_f.shape[0])
    I = int(input_size)
    H_pad = _round_up(H, 128)
    I_pad = _round_up(I, 128)

    def pack_w(w, rows, rows_pad, col_lo, col_hi):
        wp = jnp.zeros((rows_pad, H_pad), jnp.float32)
        wp = wp.at[:rows, :H].set(w[:, col_lo:col_hi].T.astype(jnp.float32))
        return wp.astype(jnp.bfloat16)

    def pack_b(b):
        return jnp.zeros((1, H_pad), jnp.float32).at[0, :H].set(b.astype(jnp.float32))

    return dict(
        wf_h=pack_w(weight_f, H, H_pad, 0, H),
        wf_x=pack_w(weight_f, I, I_pad, H, H + I),
        wn_h=pack_w(weight_n, H, H_pad, 0, H),
        wn_x=pack_w(weight_n, I, I_pad, H, H + I),
        bf=pack_b(bias_f),
        bn=pack_b(bias_n),
        H=H, I=I, H_pad=H_pad, I_pad=I_pad)


def fsu_mgu_cell(x, hx, params):
    """x: [B, I], hx: [B, H] or None -> hy: [B, H] in x.dtype."""
    B, I = x.shape
    H, H_pad, I_pad = params["H"], params["H_pad"], params["I_pad"]
    assert I == params["I"]
    K1 = H_pad + I_pad
    out_dtype = x.dtype
    out_itemsize = jnp.dtype(out_dtype).itemsize

    if hx is None:
        hx = jnp.zeros((B, H), out_dtype)

    # ---- tiling --------------------------------------------------------------
    # Batch tile: single tile for small/medium B (weights are streamed exactly
    # once regardless thanks to the j-outer grid order); 128-row tiles otherwise.
    if B <= 256:
        TM = _round_up(B, 16)
        B_pad = TM
    else:
        TM = 128
        B_pad = _round_up(B, 128)

    cap = _vmem_cap_bytes()
    # Hidden-output tile: largest of {512, 256, 128} that divides H_pad and fits
    # comfortably in VMEM (bigger lane-dense tiles amortize ~0.35us/step overhead).
    TN = 128
    for cand in (512, 256):
        if H_pad % cand != 0:
            continue
        need = 2 * (TM * K1 * 2 + K1 * cand * 2 + TM * cand * 8 + cand * 4)
        if need <= int(0.6 * cap):
            TN = cand
            break

    NB = B_pad // TM
    NJ = H_pad // TN

    # bf16 activations (half HBM/VMEM traffic, MXU-ready); zero-padded so the
    # padded lanes stay benign through the MXU accumulation.
    hx_p = _pad2(hx, B_pad, H_pad, jnp.bfloat16)
    x_p = _pad2(x, B_pad, I_pad, jnp.bfloat16)

    def _limit(need):
        return int(min(max(2 * need, 16 * 2 ** 20), int(0.85 * cap)))

    # ---- pass 1: fg and fg*hx ------------------------------------------------
    vmem1 = 2 * (TM * H_pad * 2 + TM * I_pad * 2       # hx, x tiles (bf16)
                 + H_pad * TN * 2 + I_pad * TN * 2     # W_f column tiles (bf16)
                 + TN * 4                              # b_f tile
                 + TM * TN * 4 + TM * TN * 2)          # fg (f32) + fg*hx (bf16) tiles
    cost1 = pl.CostEstimate(
        flops=2 * B_pad * K1 * H_pad, transcendentals=0,
        bytes_accessed=int(K1 * H_pad * 2 + H_pad * 4
                           + NJ * B_pad * K1 * 2 + B_pad * H_pad * (4 + 2)))

    fg, fghx = pl.pallas_call(
        functools.partial(_fg_kernel, tn=TN),
        out_shape=(jax.ShapeDtypeStruct((B_pad, H_pad), jnp.float32),
                   jax.ShapeDtypeStruct((B_pad, H_pad), jnp.bfloat16)),
        grid_spec=pltpu.PrefetchScalarGridSpec(
            num_scalar_prefetch=0,
            grid=(NJ, NB),                               # j outer, i inner
            in_specs=[
                pl.BlockSpec((TM, H_pad), lambda j, i: (i, 0)),   # hx (full width)
                pl.BlockSpec((TM, I_pad), lambda j, i: (i, 0)),   # x  (full width)
                pl.BlockSpec((H_pad, TN), lambda j, i: (0, j)),   # W_f hx-part tile
                pl.BlockSpec((I_pad, TN), lambda j, i: (0, j)),   # W_f x-part tile
                pl.BlockSpec((1, TN), lambda j, i: (0, j)),       # b_f tile
            ],
            out_specs=[
                pl.BlockSpec((TM, TN), lambda j, i: (i, j)),      # fg
                pl.BlockSpec((TM, TN), lambda j, i: (i, j)),      # fg*hx
            ],
        ),
        compiler_params=pltpu.CompilerParams(
            dimension_semantics=("parallel", "parallel"),
            vmem_limit_bytes=_limit(vmem1)),
        cost_estimate=cost1,
    )(hx_p, x_p, params["wf_h"], params["wf_x"], params["bf"])

    # ---- pass 2: ng and hy -----------------------------------------------------
    vmem2 = 2 * (TM * H_pad * 2 + TM * I_pad * 2       # fg*hx, x tiles (bf16)
                 + TM * TN * 4                         # fg tile (f32)
                 + H_pad * TN * 2 + I_pad * TN * 2     # W_n column tiles (bf16)
                 + TN * 4                              # b_n tile
                 + TM * TN * out_itemsize)             # hy tile
    cost2 = pl.CostEstimate(
        flops=2 * B_pad * K1 * H_pad, transcendentals=0,
        bytes_accessed=int(K1 * H_pad * 2 + H_pad * 4
                           + NJ * B_pad * K1 * 2 + B_pad * H_pad * 4
                           + B_pad * H_pad * out_itemsize))

    hy_pad = pl.pallas_call(
        functools.partial(_ng_kernel, tn=TN),
        out_shape=jax.ShapeDtypeStruct((B_pad, H_pad), out_dtype),
        grid_spec=pltpu.PrefetchScalarGridSpec(
            num_scalar_prefetch=0,
            grid=(NJ, NB),                               # j outer, i inner
            in_specs=[
                pl.BlockSpec((TM, H_pad), lambda j, i: (i, 0)),   # fg*hx (matmul LHS)
                pl.BlockSpec((TM, I_pad), lambda j, i: (i, 0)),   # x
                pl.BlockSpec((TM, TN), lambda j, i: (i, j)),      # fg tile (epilogue)
                pl.BlockSpec((H_pad, TN), lambda j, i: (0, j)),   # W_n hx-part tile
                pl.BlockSpec((I_pad, TN), lambda j, i: (0, j)),   # W_n x-part tile
                pl.BlockSpec((1, TN), lambda j, i: (0, j)),       # b_n tile
            ],
            out_specs=pl.BlockSpec((TM, TN), lambda j, i: (i, j)),
        ),
        compiler_params=pltpu.CompilerParams(
            dimension_semantics=("parallel", "parallel"),
            vmem_limit_bytes=_limit(vmem2)),
        cost_estimate=cost2,
    )(fghx, x_p, fg, params["wn_h"], params["wn_x"], params["bn"])

    return hy_pad[:B, :H]


def fsu_mgu_cell_ref(x, hx, weight_f, bias_f, weight_n, bias_n):
    """Plain-JAX f32 value-domain reference."""
    cat1 = jnp.concatenate([hx, x], axis=1)
    fg_in = jnp.clip(cat1 @ weight_f.T + bias_f, -1.0, 1.0)
    fg = (fg_in + 1.0) * 0.5
    fg_hx = fg * hx
    cat2 = jnp.concatenate([fg_hx, x], axis=1)
    ng = jnp.clip(cat2 @ weight_n.T + bias_n, -1.0, 1.0)
    hy = ng - fg * ng + fg_hx
    return jnp.clip(hy, -1.0, 1.0)


if __name__ == "__main__":
    B, I, H = 8, 16, 32
    key = jax.random.PRNGKey(0)
    k_x, k_h, k_wf, k_bf, k_wn, k_bn = jax.random.split(key, 6)

    # Bipolar-domain inputs in [-1, 1]; weights with nn.Linear-style fan-in scale.
    x = jax.random.uniform(k_x, (B, I), jnp.float32, -1.0, 1.0)
    hx = jax.random.uniform(k_h, (B, H), jnp.float32, -1.0, 1.0)
    bound = 1.0 / (H + I) ** 0.5
    weight_f = jax.random.uniform(k_wf, (H, H + I), jnp.float32, -bound, bound)
    bias_f = jax.random.uniform(k_bf, (H,), jnp.float32, -bound, bound)
    weight_n = jax.random.uniform(k_wn, (H, H + I), jnp.float32, -bound, bound)
    bias_n = jax.random.uniform(k_bn, (H,), jnp.float32, -bound, bound)

    params = prepare_mgu_params(weight_f, bias_f, weight_n, bias_n, input_size=I)
    hy = jax.block_until_ready(fsu_mgu_cell(x, hx, params))
    hy_ref = fsu_mgu_cell_ref(x, hx, weight_f, bias_f, weight_n, bias_n)

    assert hy.shape == (B, H)
    # bf16 MXU operands / bf16 fg*hx carry introduce ~1e-3..1e-2 absolute error;
    # the original stochastic-computing module carries 2**-8 bitstream
    # quantization noise on top of that anyway.
    assert bool(jnp.allclose(hy, hy_ref, atol=5e-2, rtol=0.0))
    print("KERNEL_OK")
</pallas_src>

<mosaic_0001>
module attributes {stable_mosaic.version = 11 : i64} {
  func.func @_fg_kernel(%arg0: i32, %arg1: i32, %arg2: memref<16x128xbf16, #tpu.memory_space<vmem>>, %arg3: memref<16x128xbf16, #tpu.memory_space<vmem>>, %arg4: memref<128x128xbf16, #tpu.memory_space<vmem>>, %arg5: memref<128x128xbf16, #tpu.memory_space<vmem>>, %arg6: memref<1x128xf32, #tpu.memory_space<vmem>>, %arg7: memref<16x128xf32, #tpu.memory_space<vmem>>, %arg8: memref<16x128xbf16, #tpu.memory_space<vmem>>) attributes {dimension_semantics = [#tpu.dimension_semantics<parallel>, #tpu.dimension_semantics<parallel>], iteration_bounds = array<i64: 1, 1>, scalar_prefetch = 0 : i64, scratch_operands = 0 : i64, tpu.core_type = #tpu.core_type<tc>, window_params = [{transform_indices = @transform_0, window_bounds = array<i64: 16, 128>}, {transform_indices = @transform_1, window_bounds = array<i64: 16, 128>}, {transform_indices = @transform_2, window_bounds = array<i64: 128, 128>}, {transform_indices = @transform_3, window_bounds = array<i64: 128, 128>}, {transform_indices = @transform_4, window_bounds = array<i64: 1, 128>}, {transform_indices = @transform_5, window_bounds = array<i64: 16, 128>}, {transform_indices = @transform_6, window_bounds = array<i64: 16, 128>}]} {
    %c0 = arith.constant 0 : index
    %c0_0 = arith.constant 0 : index
    %0 = vector.load %arg2[%c0, %c0_0] : memref<16x128xbf16, #tpu.memory_space<vmem>>, vector<16x128xbf16>
    %c0_1 = arith.constant 0 : index
    %c0_2 = arith.constant 0 : index
    %1 = vector.load %arg4[%c0_1, %c0_2] : memref<128x128xbf16, #tpu.memory_space<vmem>>, vector<128x128xbf16>
    %cst = arith.constant dense<0.000000e+00> : vector<16x128xf32>
    %2 = tpu.matmul %0, %1, %cst {dimension_numbers = #tpu.dot_dimension_numbers<[1], [0], [0], [1], [0, 0, 1, 1], [], []>} : vector<16x128xbf16>, vector<128x128xbf16>, vector<16x128xf32> -> vector<16x128xf32>
    %c0_3 = arith.constant 0 : index
    %c0_4 = arith.constant 0 : index
    %3 = vector.load %arg3[%c0_3, %c0_4] : memref<16x128xbf16, #tpu.memory_space<vmem>>, vector<16x128xbf16>
    %c0_5 = arith.constant 0 : index
    %c0_6 = arith.constant 0 : index
    %4 = vector.load %arg5[%c0_5, %c0_6] : memref<128x128xbf16, #tpu.memory_space<vmem>>, vector<128x128xbf16>
    %cst_7 = arith.constant dense<0.000000e+00> : vector<16x128xf32>
    %5 = tpu.matmul %3, %4, %cst_7 {dimension_numbers = #tpu.dot_dimension_numbers<[1], [0], [0], [1], [0, 0, 1, 1], [], []>} : vector<16x128xbf16>, vector<128x128xbf16>, vector<16x128xf32> -> vector<16x128xf32>
    %6 = arith.addf %2, %5 : vector<16x128xf32>
    %c0_8 = arith.constant 0 : index
    %c0_9 = arith.constant 0 : index
    %7 = vector.load %arg6[%c0_8, %c0_9] : memref<1x128xf32, #tpu.memory_space<vmem>>, vector<1x128xf32>
    %8 = vector.broadcast %7 : vector<1x128xf32> to vector<16x128xf32>
    %9 = arith.addf %6, %8 : vector<16x128xf32>
    %cst_10 = arith.constant -1.000000e+00 : f32
    %cst_11 = arith.constant 1.000000e+00 : f32
    %10 = vector.broadcast %cst_10 : f32 to vector<16x128xf32>
    %11 = arith.maximumf %10, %9 : vector<16x128xf32>
    %12 = vector.broadcast %cst_11 : f32 to vector<16x128xf32>
    %13 = arith.minimumf %12, %11 : vector<16x128xf32>
    %cst_12 = arith.constant 1.000000e+00 : f32
    %14 = vector.broadcast %cst_12 : f32 to vector<16x128xf32>
    %15 = arith.addf %13, %14 : vector<16x128xf32>
    %cst_13 = arith.constant 5.000000e-01 : f32
    %16 = vector.broadcast %cst_13 : f32 to vector<16x128xf32>
    %17 = arith.mulf %15, %16 : vector<16x128xf32>
    %c128_i32 = arith.constant 128 : i32
    %18 = arith.muli %arg0, %c128_i32 : i32
    %19 = tpu.assume_multiple %18, 128 : i32
    %c0_14 = arith.constant 0 : index
    %20 = arith.index_cast %19 : i32 to index
    %21 = vector.load %arg2[%c0_14, %20] : memref<16x128xbf16, #tpu.memory_space<vmem>>, vector<16x128xbf16>
    %22 = arith.extf %21 : vector<16x128xbf16> to vector<16x128xf32>
    %c0_15 = arith.constant 0 : index
    %c0_16 = arith.constant 0 : index
    %23 = vector.load %arg7[%c0_15, %c0_16] : memref<16x128xf32, #tpu.memory_space<vmem>>, vector<16x128xf32>
    tpu.vector_store %arg7[%c0_15, %c0_16], %17 {strides = array<i32>} : memref<16x128xf32, #tpu.memory_space<vmem>>, vector<16x128xf32>,
    %24 = arith.mulf %17, %22 : vector<16x128xf32>
    %25 = arith.truncf %24 : vector<16x128xf32> to vector<16x128xbf16>
    %c0_17 = arith.constant 0 : index
    %c0_18 = arith.constant 0 : index
    %26 = vector.load %arg8[%c0_17, %c0_18] : memref<16x128xbf16, #tpu.memory_space<vmem>>, vector<16x128xbf16>
    tpu.vector_store %arg8[%c0_17, %c0_18], %25 {strides = array<i32>} : memref<16x128xbf16, #tpu.memory_space<vmem>>, vector<16x128xbf16>,
    return
  }
  func.func @transform_0(%arg0: i32, %arg1: i32) -> (i32, i32) {
    %c0_i32 = arith.constant 0 : i32
    %c0_i32_0 = arith.constant 0 : i32
    return %arg1, %c0_i32 : i32, i32
  }
  func.func @transform_1(%arg0: i32, %arg1: i32) -> (i32, i32) {
    %c0_i32 = arith.constant 0 : i32
    %c0_i32_0 = arith.constant 0 : i32
    return %arg1, %c0_i32 : i32, i32
  }
  func.func @transform_2(%arg0: i32, %arg1: i32) -> (i32, i32) {
    %c0_i32 = arith.constant 0 : i32
    %c0_i32_0 = arith.constant 0 : i32
    return %c0_i32, %arg0 : i32, i32
  }
  func.func @transform_3(%arg0: i32, %arg1: i32) -> (i32, i32) {
    %c0_i32 = arith.constant 0 : i32
    %c0_i32_0 = arith.constant 0 : i32
    return %c0_i32, %arg0 : i32, i32
  }
  func.func @transform_4(%arg0: i32, %arg1: i32) -> (i32, i32) {
    %c0_i32 = arith.constant 0 : i32
    %c0_i32_0 = arith.constant 0 : i32
    return %c0_i32, %arg0 : i32, i32
  }
  func.func @transform_5(%arg0: i32, %arg1: i32) -> (i32, i32) {
    %c0_i32 = arith.constant 0 : i32
    return %arg1, %arg0 : i32, i32
  }
  func.func @transform_6(%arg0: i32, %arg1: i32) -> (i32, i32) {
    %c0_i32 = arith.constant 0 : i32
    return %arg1, %arg0 : i32, i32
  }
}

</mosaic_0001>

<bundles_post_ra>
// kernel: tpu_custom_call.1
= control target key start
LH: loop header
LB: loop body
LE: loop exit
PB: predicated region body
PF: predicated region fallthrough
CT: control target
= control target key end

     0   :  { %12 = vsyncpa [#allocation3], 0  ;;  %s678_s0 = inlined_call_operand.hbm [shape: bf16[16,128], index: 0, kind: input, shape index: {}]   ;;  %s679_s1 = inlined_call_operand.hbm [shape: bf16[16,128], index: 1, kind: input, shape index: {}]   ;;  %s680_s2 = inlined_call_operand.hbm [shape: bf16[128,128], index: 2, kind: input, shape index: {}]   ;;  %s681_s3 = inlined_call_operand.hbm [shape: bf16[128,128], index: 3, kind: input, shape index: {}]   ;;  %s682_s4 = inlined_call_operand.vmem [shape: f32[1,128], index: 4, kind: input, shape index: {}]   ;;  %s683_s5 = inlined_call_operand.hbm [shape: f32[16,128], index: 5, kind: output, shape index: {0}]   ;;  %s684_s6 = inlined_call_operand.hbm [shape: bf16[16,128], index: 6, kind: output, shape index: {1}]  }
   0x1   :  { %13 = vsyncpa [#allocation6], 0 }
   0x2   :  { %14 = vsyncpa [#allocation9], 0 }
   0x3   :  { %15 = vsyncpa [#allocation4], 0 }
   0x4   :  { %16 = vsyncpa [#allocation12], 0  ;;  %s34_s23 = sshll.u32 %s679_s1, 4  ;;  %s597_s24 = smov [#allocation5]   ;;  %s35_s23 = int_to_ptr.hbm [resolvable:$true] %s34_s23 }
   0x5   :  { %s36_s25 = sshll.u32 %s597_s24, 4  ;;  %s21_s28 = sshll.u32 %s678_s0, 4  ;;  %s37_s25 = int_to_ptr.vmem [resolvable:$true] %s36_s25  ;;  %s22_s28 = int_to_ptr.hbm [resolvable:$true] %s21_s28 }
   0x6   :  { %s598_s29 = smov 64   ;;  %s599_s30 = smov 4  }
   0x7   :  { %42 = dma.hbm_to_vmem [thread:$0]  %s35_s23, 128, %s37_s25, [#allocation6], %s598_s29, %s598_s29, %s599_s30  }
   0x8   :  { %s600_s7 = smov [#allocation2]   ;;  %s47_s1 = sshll.u32 %s680_s2, 4  ;;  %s48_s1 = int_to_ptr.hbm [resolvable:$true] %s47_s1 }
   0x9   :  { %s23_s8 = sshll.u32 %s600_s7, 4  ;;  %s60_s12 = sshll.u32 %s681_s3, 4  ;;  %s24_s8 = int_to_ptr.vmem [resolvable:$true] %s23_s8  ;;  %s61_s12 = int_to_ptr.hbm [resolvable:$true] %s60_s12 }
   0xa   :  { %29 = dma.hbm_to_vmem [thread:$0]  %s22_s28, 128, %s24_s8, [#allocation3], %s598_s29, %s598_s29, %s599_s30  }
   0xb   :  { %s601_s13 = smov [#allocation7]   ;;  %s602_s15 = smov [#allocation8]  }
   0xc   :  { %s49_s14 = sshll.u32 %s601_s13, 4  ;;  %s62_s2 = sshll.u32 %s602_s15, 4  ;;  %s50_s14 = int_to_ptr.vmem [resolvable:$true] %s49_s14  ;;  %s63_s2 = int_to_ptr.vmem [resolvable:$true] %s62_s2 }
   0xd   :  { %55 = dma.hbm_to_vmem [thread:$0]  %s48_s1, 1024, %s50_s14, [#allocation6], %s598_s29, %s598_s29, %s599_s30  }
   0xe   :  { %68 = dma.hbm_to_vmem [thread:$0]  %s61_s12, 1024, %s63_s2, [#allocation9], %s598_s29, %s598_s29, %s599_s30  }
   0xf   :  { %587 = dma.done.wait [#allocation3], 128  }
  0x10   :  { %588 = vsyncadd [#allocation3], 4294967168 }
  0x11   :  { %589 = dma.done.wait [#allocation6], 1152  }
  0x12   :  { %590 = vsyncadd [#allocation6], 4294966144 }
  0x13   :  { %591 = dma.done.wait [#allocation9], 1024  }
  0x14   :  { %592 = vsyncadd [#allocation9], 4294966272  ;;  %v422_v0 = vld [vmem:[#allocation8 + $0x38] sm:$0xff]  ;;  %v421_v2 = vld [vmem:[#allocation8 + $0x30] sm:$0xff]  ;;  %s603_s17 = smov [#allocation10]   ;;  %s604_s21 = smov [#allocation11]  }
  0x15   :  { %v413_v1 = vld [vmem:[#allocation7 + $0x38] sm:$0xff]  ;;  %177 = vmatpush.bf16.msra.mxu0 %v422_v0  ;;  %v412_v3 = vld [vmem:[#allocation7 + $0x30] sm:$0xff]  ;;  %v420_v4 = vld [vmem:[#allocation8 + $0x28] sm:$0xff]  ;;  %s294_s18 = sshll.u32 %s603_s17, 4  ;;  %s307_s22 = sshll.u32 %s604_s21, 4  ;;  %s295_s18 = int_to_ptr.vmem [resolvable:$true] %s294_s18  ;;  %s308_s22 = int_to_ptr.vmem [resolvable:$true] %s307_s22 }
  0x16   :  { %245 = vmatpush.bf16.msra.mxu1 %v413_v1  ;;  %v411_v5 = vld [vmem:[#allocation7 + $0x28] sm:$0xff]  ;;  %v419_v6 = vld [vmem:[#allocation8 + $0x20] sm:$0xff]  ;;  %v418_v8 = vld [vmem:[#allocation8 + $0x18] sm:$0xff]  ;;  %s309_s25 = sshll.u32 %s684_s6, 4  ;;  %s605_s26 = smov 128   ;;  %s310_s25 = int_to_ptr.hbm [resolvable:$true] %s309_s25 }
  0x17   :  { %v410_v7 = vld [vmem:[#allocation7 + $0x20] sm:$0xff]  ;;  %v409_v9 = vld [vmem:[#allocation7 + $0x18] sm:$0xff]  ;;  %v417_v10 = vld [vmem:[#allocation8 + $0x10] sm:$0xff]  ;;  %s606_s27 = smov 8  }
  0x18   :  { %v408_v11 = vld [vmem:[#allocation7 + $0x10] sm:$0xff]  ;;  %v416_v12 = vld [vmem:[#allocation8 + $0x8] sm:$0xff]  ;;  %v415_v14 = vld [vmem:[#allocation8] sm:$0xff] }
  0x19   :  { %178 = vmatpush.bf16.msra.mxu0 %v421_v2  ;;  %v407_v13 = vld [vmem:[#allocation7 + $0x8] sm:$0xff]  ;;  %v406_v15 = vld [vmem:[#allocation7] sm:$0xff]  ;;  %v414_v16 = vld [vmem:[#allocation5] sm:$0xff] }
  0x1a   :  { %246 = vmatpush.bf16.msra.mxu1 %v412_v3  ;;  %v405_v17 = vld [vmem:[#allocation2] sm:$0xff] }
  0x1b   :  { %v442_v18 = vld [vmem:[%s682_s4] ss:$0 sm:$0xff]  ;;  %s296_s4 = sshll.u32 %s683_s5, 4  ;;  %s297_s4 = int_to_ptr.hbm [resolvable:$true] %s296_s4 }
  0x1c   :  { %v424_v30 = vld [vmem:[#allocation2] sm:$0xff]  }
  0x1d   :  { %179 = vmatpush.bf16.msra.mxu0 %v420_v4  ;;  %v425_v32 = vunpack.c.l.bf16 %v424_v30  ;;  %v426_v34 = vunpack.c.h.bf16 %v424_v30 }
  0x1e   :  { %247 = vmatpush.bf16.msra.mxu1 %v411_v5 }
  0x21   :  { %180 = vmatpush.bf16.msra.mxu0 %v419_v6 }
  0x22   :  { %248 = vmatpush.bf16.msra.mxu1 %v410_v7 }
  0x25   :  { %181 = vmatpush.bf16.msra.mxu0 %v418_v8 }
  0x26   :  { %249 = vmatpush.bf16.msra.mxu1 %v409_v9 }
  0x29   :  { %182 = vmatpush.bf16.msra.mxu0 %v417_v10 }
  0x2a   :  { %250 = vmatpush.bf16.msra.mxu1 %v408_v11 }
  0x2d   :  { %183 = vmatpush.bf16.msra.mxu0 %v416_v12 }
  0x2e   :  { %251 = vmatpush.bf16.msra.mxu1 %v407_v13 }
  0x31   :  { %184 = vmatpush.bf16.msra.mxu0 %v415_v14 }
  0x32   :  { %252 = vmatpush.bf16.msra.mxu1 %v406_v15 }
  0x34   :  { %185 = vmatmul.bf16.vlgmr.msra.gmra.mxu0 %v414_v16 }
  0x35   :  { %253 = vmatmul.bf16.vlgmr.msra.gmra.mxu1 %v405_v17 }
  0xb1   :  { %v186_v19 = vpop.f32.mrf.mxu0 }
  0xb2   :  { %v254_v20 = vpop.f32.mrf.mxu1 }
  0xb3   :  { %v255_v21 = vadd.f32 %v254_v20, %v186_v19 }
  0xb5   :  { %v263_v22 = vadd.f32 %v442_v18, %v255_v21 }
  0xb7   :  { %v403_v23 = vclamps-f32 %v263_v22, 1.0 }
  0xb9   :  { %v269_v24 = vadd.f32 1.0, %v403_v23  ;;  %v188_v25 = vpop.f32.mrf.mxu0 }
  0xba   :  { %v256_v26 = vpop.f32.mrf.mxu1 }
  0xbb   :  { %v271_v27 = vmul.f32 0.5, %v269_v24  ;;  %v257_v28 = vadd.f32 %v256_v26, %v188_v25 }
  0xbd   :  { %282 = vst [vmem:[#allocation10] sm:$0xff] %v271_v27  ;;  %v264_v29 = vadd.f32 %v442_v18, %v257_v28  ;;  %v284_v36 = vmul.f32 %v425_v32, %v271_v27 }
  0xbf   :  { %v404_v31 = vclamps-f32 %v264_v29, 1.0 }
  0xc1   :  { %v270_v33 = vadd.f32 1.0, %v404_v31 }
  0xc3   :  { %v272_v35 = vmul.f32 0.5, %v270_v33 }
  0xc5   :  { %283 = vst [vmem:[#allocation10 + $0x8] sm:$0xff] %v272_v35  ;;  %v285_v37 = vmul.f32 %v426_v34, %v272_v35 }
  0xc6   :  { %302 = dma.vmem_to_hbm [thread:$0]  %s295_s18, 256, %s297_s4, [#allocation4], %s605_s26, %s605_s26, %s606_s27  }
  0xc7   :  { %v430_v38 = vpack.c.bf16 %v285_v37, %v284_v36 }
  0xc9   :  { %431 = vst [vmem:[#allocation11] sm:$0xff] %v430_v38  }
  0xca   :  { %315 = dma.vmem_to_hbm [thread:$0]  %s308_s22, 128, %s310_s25, [#allocation12], %s598_s29, %s598_s29, %s599_s30  }
  0xcb   :  { %593 = dma.done.wait [#allocation4], 256  }
  0xcc   :  { %594 = vsyncadd [#allocation4], 4294967040 }
  0xcd   :  { %595 = dma.done.wait [#allocation12], 128  }
  0xce   :  { %596 = vsyncadd [#allocation12], 4294967168 }
  0xcf   :  { %324 = vsyncpa [#allocation3], 1 }
  0xd0   :  { %325 = vsyncpa [#allocation6], 1 }
  0xd1   :  { %326 = vsyncpa [#allocation9], 1 }
  0xd2   :  { %327 = vsyncpa [#allocation4], 1 }
  0xd3   :  { %328 = vsyncpa [#allocation12], 1 }

</bundles_post_ra>
